<compile_context>
chip_gen: v5e
topology: v5e:2x2
jax: 0.10.0
libtpu: 0.0.40
codegen_flags: <defaults>
</compile_context>

<pallas_src>
import functools

import jax
import jax.numpy as jnp
from jax.experimental import pallas as pl
from jax.experimental.pallas import tpu as pltpu


def _round_up(a, m):
    return (a + m - 1) // m * m


def _cdiv(a, m):
    return -(-a // m)


# ----------------------------------------------------------------------------
# Pallas kernel: one stacked-K MXU matmul (all kh*kw taps) + bias + Softsign.
# Output is transposed (C_out_pad, TILE_M) so the flattened batch*spatial axis
# is lane-dense (unmasked full-width stores).
# ----------------------------------------------------------------------------
def _conv_act_kernel(kw, apply_softsign, x_ref, xh_ref, w_ref, b_ref, o_ref):
    tile = o_ref.shape[-1]
    # Main tile + small fixed right halo (covers the kw-1 lane shifts).
    x = jnp.concatenate([x_ref[...], xh_ref[...]], axis=-1)      # (k_in, tile+halo) bf16
    # Stack the kw lane-shifted views -> one (kw*k_in, tile) MXU RHS.
    xs = jnp.concatenate([x[:, j:j + tile] for j in range(kw)], axis=0)
    # Single contraction over K = kw * kh * C_in (accumulation stays in the MXU).
    acc = jnp.dot(w_ref[...], xs, preferred_element_type=jnp.float32)  # (c_out_pad, tile)
    acc = acc + b_ref[...]                                       # (c_out_pad, 1) broadcast, f32
    if apply_softsign:
        # Softsign(x) = x / (1 + |x|); denominator >= 1 so approx reciprocal is safe.
        acc = acc * pl.reciprocal(1.0 + jnp.abs(acc), approx=True)
    o_ref[...] = acc.astype(o_ref.dtype)                         # bf16 store (bounded output)


# ----------------------------------------------------------------------------
# Wrapper: ConvAct forward (PyTorch NCHW semantics).
# ----------------------------------------------------------------------------
def conv_act(x, w, b, *, stride=1, padding=0, softsign=True, tile_m=8192):
    """x: (N, C_in, H, W) f32, w: (C_out, C_in, kh, kw) f32, b: (C_out,) f32."""
    N, C_in, H, W = x.shape
    C_out, C_in2, kh, kw = w.shape
    assert C_in == C_in2

    H_p, W_p = H + 2 * padding, W + 2 * padding
    assert H_p >= kh and W_p >= kw
    Ho = (H_p - kh) // stride + 1
    Wo = (W_p - kw) // stride + 1

    m_real = N * H_p * W_p
    halo = _round_up(max(kw - 1, 1), 128)                  # fixed lane halo (W-independent)
    # Big tiles amortize per-step overhead, but cap so nt >= 2 (v7x megacore).
    tile_cap = _round_up(_cdiv(m_real, 2), halo)
    tile = max(halo, min(_round_up(tile_m, halo), tile_cap))
    nt = _cdiv(m_real, tile)                               # grid steps over M
    m_out = nt * tile
    m_x = m_out + halo

    k_in = _round_up(kh * C_in, 16)                        # bf16 sublane-packing friendly
    c_out_pad = _round_up(C_out, 16)

    # ---- operand prep (layout plumbing only) --------------------------------
    # Pad spatially, flatten channels-major over (N, H_p, W_p).
    x_p = jnp.pad(x, ((0, 0), (0, 0), (padding, padding), (padding, padding)))
    x_flat = x_p.transpose(1, 0, 2, 3).reshape(C_in, m_real)          # (C_in, N*H_p*W_p)
    # Pre-stack kh row-shifted copies: row block i holds x_flat[:, m + i*W_p].
    ext = m_x + (kh - 1) * W_p
    x_ext = jnp.pad(x_flat, ((0, 0), (0, ext - m_real)))
    x_stack = jnp.concatenate(
        [x_ext[:, i * W_p: i * W_p + m_x] for i in range(kh)], axis=0)  # (kh*C_in, m_x)
    x_stack = jnp.pad(x_stack, ((0, k_in - kh * C_in), (0, 0))).astype(jnp.bfloat16)

    # Weight matrix (c_out_pad, kw*k_in): K index ordered (j, i, c) to match the
    # kernel's lane-shift stacking.  w_mat[o, j*k_in + i*C_in + c] = w[o, c, i, j].
    w_t = w.transpose(3, 2, 1, 0).reshape(kw, kh * C_in, C_out)
    w_t = jnp.pad(w_t, ((0, 0), (0, k_in - kh * C_in), (0, c_out_pad - C_out)))
    w_mat = w_t.transpose(2, 0, 1).reshape(c_out_pad, kw * k_in).astype(jnp.bfloat16)
    b_col = jnp.pad(b, (0, c_out_pad - C_out)).astype(jnp.float32).reshape(c_out_pad, 1)

    kernel = functools.partial(_conv_act_kernel, kw, softsign)
    y_t = pl.pallas_call(
        kernel,
        out_shape=jax.ShapeDtypeStruct((c_out_pad, m_out), jnp.bfloat16),
        grid_spec=pltpu.PrefetchScalarGridSpec(
            num_scalar_prefetch=0,
            grid=(nt,),
            in_specs=[
                # main M tile of the stacked input
                pl.BlockSpec((k_in, tile), lambda i: (0, i)),
                # right halo: next `halo` lanes after the tile (same array)
                pl.BlockSpec((k_in, halo), lambda i: (0, (i + 1) * (tile // halo))),
                # weights + bias: resident in VMEM across all grid steps
                pl.BlockSpec((c_out_pad, kw * k_in), lambda i: (0, 0)),
                pl.BlockSpec((c_out_pad, 1), lambda i: (0, 0)),
            ],
            out_specs=pl.BlockSpec((c_out_pad, tile), lambda i: (0, i)),
        ),
        compiler_params=pltpu.CompilerParams(
            dimension_semantics=("parallel",),
            vmem_limit_bytes=32 * 1024 * 1024),
    )(x_stack, x_stack, w_mat, b_col)

    # ---- unpack: strip channel padding, drop tail columns, NCHW -------------
    # TODO(synk): for stride > 1, subsample inside the kernel (strided output
    # index_map) instead of computing the dense stride-1 map and discarding it;
    # and let the consumer take the (C, N, H, W) layout to skip this transpose.
    y_full = y_t[:C_out, :m_real].reshape(C_out, N, H_p, W_p)
    y = y_full[:, :, ::stride, ::stride][:, :, :Ho, :Wo]
    return y.transpose(1, 0, 2, 3).astype(x.dtype)         # (N, C_out, Ho, Wo)


# ----------------------------------------------------------------------------
# Deterministic PyTorch-style init (uniform +-1/sqrt(fan_in))
# ----------------------------------------------------------------------------
def init_conv_act_params(key, in_ch, out_ch, f):
    kw_key, kb_key = jax.random.split(key)
    bound = float(in_ch * f * f) ** -0.5
    w = jax.random.uniform(kw_key, (out_ch, in_ch, f, f), jnp.float32, -bound, bound)
    b = jax.random.uniform(kb_key, (out_ch,), jnp.float32, -bound, bound)
    return w, b


if __name__ == "__main__":
    key = jax.random.PRNGKey(0)
    pkey, xkey = jax.random.split(key)

    IN_CH, OUT_CH, F, S, P = 4, 16, 3, 1, 1
    w, b = init_conv_act_params(pkey, IN_CH, OUT_CH, F)
    x = jax.random.normal(xkey, (2, IN_CH, 16, 16), dtype=jnp.float32)

    fwd = jax.jit(functools.partial(conv_act, stride=S, padding=P, softsign=True))
    out = jax.block_until_ready(fwd(x, w, b))

    assert out.shape == (2, OUT_CH, 16, 16), out.shape
    assert bool(jnp.all(jnp.isfinite(out)))

    # Correctness vs f32 XLA conv reference (bf16 MXU inputs, bf16 output and
    # approx reciprocal give small drift; Softsign output is bounded so an
    # absolute tolerance is safe).
    ref = jax.lax.conv_general_dilated(
        x, w, window_strides=(S, S), padding=[(P, P), (P, P)],
        dimension_numbers=("NCHW", "OIHW", "NCHW"))
    ref = ref + b[None, :, None, None]
    ref = ref / (1.0 + jnp.abs(ref))
    err = float(jnp.max(jnp.abs(out - ref)))
    assert err < 5e-2, f"max abs err {err}"

    print("KERNEL_OK")
</pallas_src>

<mosaic_0001>
module attributes {stable_mosaic.version = 11 : i64} {
  func.func @_conv_act_kernel(%arg0: i32, %arg1: memref<16x384xbf16, #tpu.memory_space<vmem>>, %arg2: memref<16x128xbf16, #tpu.memory_space<vmem>>, %arg3: memref<16x48xbf16, #tpu.memory_space<vmem>>, %arg4: memref<16x1xf32, #tpu.memory_space<vmem>>, %arg5: memref<16x384xbf16, #tpu.memory_space<vmem>>) attributes {dimension_semantics = [#tpu.dimension_semantics<parallel>], iteration_bounds = array<i64: 2>, scalar_prefetch = 0 : i64, scratch_operands = 0 : i64, tpu.core_type = #tpu.core_type<tc>, window_params = [{transform_indices = @transform_0, window_bounds = array<i64: 16, 384>}, {transform_indices = @transform_1, window_bounds = array<i64: 16, 128>}, {pipeline_mode = #tpu.pipeline_mode<synchronous>, transform_indices = @transform_2, window_bounds = array<i64: 16, 48>}, {pipeline_mode = #tpu.pipeline_mode<synchronous>, transform_indices = @transform_3, window_bounds = array<i64: 16, 1>}, {transform_indices = @transform_4, window_bounds = array<i64: 16, 384>}]} {
    %c0 = arith.constant 0 : index
    %c0_0 = arith.constant 0 : index
    %0 = vector.load %arg1[%c0, %c0_0] : memref<16x384xbf16, #tpu.memory_space<vmem>>, vector<16x384xbf16>
    %c0_1 = arith.constant 0 : index
    %c0_2 = arith.constant 0 : index
    %1 = vector.load %arg2[%c0_1, %c0_2] : memref<16x128xbf16, #tpu.memory_space<vmem>>, vector<16x128xbf16>
    %2 = tpu.concatenate %0, %1 in 1 : vector<16x384xbf16>, vector<16x128xbf16> -> vector<16x512xbf16>
    %3 = vector.extract_strided_slice %2 {offsets = [0, 0], sizes = [16, 384], strides = [1, 1]} : vector<16x512xbf16> to vector<16x384xbf16>
    %4 = vector.extract_strided_slice %2 {offsets = [0, 1], sizes = [16, 384], strides = [1, 1]} : vector<16x512xbf16> to vector<16x384xbf16>
    %5 = vector.extract_strided_slice %2 {offsets = [0, 2], sizes = [16, 384], strides = [1, 1]} : vector<16x512xbf16> to vector<16x384xbf16>
    %6 = tpu.concatenate %3, %4, %5 in 0 : vector<16x384xbf16>, vector<16x384xbf16>, vector<16x384xbf16> -> vector<48x384xbf16>
    %c0_3 = arith.constant 0 : index
    %c0_4 = arith.constant 0 : index
    %7 = vector.load %arg3[%c0_3, %c0_4] : memref<16x48xbf16, #tpu.memory_space<vmem>>, vector<16x48xbf16>
    %cst = arith.constant dense<0.000000e+00> : vector<16x384xf32>
    %8 = tpu.matmul %7, %6, %cst {dimension_numbers = #tpu.dot_dimension_numbers<[1], [0], [0], [1], [0, 0, 1, 1], [], []>} : vector<16x48xbf16>, vector<48x384xbf16>, vector<16x384xf32> -> vector<16x384xf32>
    %c0_5 = arith.constant 0 : index
    %c0_6 = arith.constant 0 : index
    %9 = vector.load %arg4[%c0_5, %c0_6] : memref<16x1xf32, #tpu.memory_space<vmem>>, vector<16x1xf32>
    %10 = vector.broadcast %9 : vector<16x1xf32> to vector<16x384xf32>
    %11 = arith.addf %8, %10 : vector<16x384xf32>
    %12 = math.absf %11 : vector<16x384xf32>
    %cst_7 = arith.constant 1.000000e+00 : f32
    %13 = vector.broadcast %cst_7 : f32 to vector<16x384xf32>
    %14 = arith.addf %13, %12 : vector<16x384xf32>
    %15 = tpu.reciprocal %14 {approx = true} : vector<16x384xf32> -> vector<16x384xf32>
    %16 = arith.mulf %11, %15 : vector<16x384xf32>
    %17 = arith.truncf %16 : vector<16x384xf32> to vector<16x384xbf16>
    %c0_8 = arith.constant 0 : index
    %c0_9 = arith.constant 0 : index
    %18 = vector.load %arg5[%c0_8, %c0_9] : memref<16x384xbf16, #tpu.memory_space<vmem>>, vector<16x384xbf16>
    tpu.vector_store %arg5[%c0_8, %c0_9], %17 {strides = array<i32>} : memref<16x384xbf16, #tpu.memory_space<vmem>>, vector<16x384xbf16>,
    return
  }
  func.func @transform_0(%arg0: i32) -> (i32, i32) {
    %c0_i32 = arith.constant 0 : i32
    %c0_i32_0 = arith.constant 0 : i32
    return %c0_i32, %arg0 : i32, i32
  }
  func.func @transform_1(%arg0: i32) -> (i32, i32) {
    %c1_i32 = arith.constant 1 : i32
    %0 = arith.addi %arg0, %c1_i32 : i32
    %c3_i32 = arith.constant 3 : i32
    %1 = arith.muli %0, %c3_i32 : i32
    %c0_i32 = arith.constant 0 : i32
    %c0_i32_0 = arith.constant 0 : i32
    return %c0_i32, %1 : i32, i32
  }
  func.func @transform_2(%arg0: i32) -> (i32, i32) {
    %c0_i32 = arith.constant 0 : i32
    %c0_i32_0 = arith.constant 0 : i32
    %c0_i32_1 = arith.constant 0 : i32
    return %c0_i32, %c0_i32_0 : i32, i32
  }
  func.func @transform_3(%arg0: i32) -> (i32, i32) {
    %c0_i32 = arith.constant 0 : i32
    %c0_i32_0 = arith.constant 0 : i32
    %c0_i32_1 = arith.constant 0 : i32
    return %c0_i32, %c0_i32_0 : i32, i32
  }
  func.func @transform_4(%arg0: i32) -> (i32, i32) {
    %c0_i32 = arith.constant 0 : i32
    %c0_i32_0 = arith.constant 0 : i32
    return %c0_i32, %arg0 : i32, i32
  }
}

</mosaic_0001>

<bundles_post_ra>
// kernel: conv_act.1
= control target key start
LH: loop header
LB: loop body
LE: loop exit
PB: predicated region body
PF: predicated region fallthrough
CT: control target
= control target key end

     0   :  { %s1785_s0 = inlined_call_operand.vmem [shape: bf16[16,896], index: 0, kind: input, shape index: {}, may-alias: {0,1}]   ;;  %s1786_s1 = inlined_call_operand.vmem [shape: bf16[16,896], index: 1, kind: input, shape index: {}, may-alias: {0,1}]   ;;  %s1787_s2 = inlined_call_operand.vmem [shape: bf16[16,48], index: 2, kind: input, shape index: {}]   ;;  %s1788_s3 = inlined_call_operand.vmem [shape: f32[16,1], index: 3, kind: input, shape index: {}]   ;;  %s1789_s4 = inlined_call_operand.vmem [shape: bf16[16,768], index: 4, kind: output, shape index: {}]  }
   0x1   :  { %1792 = sst [smem:[#allocation7_spill]] %s1785_s0 }
   0x2   :  { %s1379_s15 = smov 0   ;;  %s1381_s16 = smov 0  }
   0x3   :  { %s1383_s17 = smov 0   ;;  %s1385_s18 = smov 0  }
   0x4   :  { %s1387_s19 = smov 0  }
   0x5 LB: > { %1793 = sst [smem:[#allocation5_spill]] %s1279_s18  ;;  %s1790_s20 = sadd.s32 4294967295, %s1283_s19   ;;  %s1283_s19 = sphi %s1387_s19, %s1813_s19   ;;  %s1279_s18 = sphi %s1385_s18, %s1810_s18   ;;  %s1275_s17 = sphi %s1383_s17, %s1809_s17   ;;  %s1271_s16 = sphi %s1381_s16, %s1812_s16   ;;  %s1267_s15 = sphi %s1379_s15, %s1811_s15  }
   0x6   : > { %s1406_s21 = sadd.s32 1, %s1283_s19   ;;  %s21_s23 = sadd.s32 1, %s1279_s18 }
   0x7   : > { %s18_s22 = ssub.s32 %s1283_s19, %s1406_s21  ;;  %p28_p1 = scmp.ne.s32.totalorder %s1279_s18, %s1275_s17 }
   0x8   : > { %p19_p0 = scmp.eq.s32.totalorder %s18_s22, 0  ;;  %p29_p2 = scmp.eq.s32.totalorder %s1283_s19, 0 }
   0x9   : > { %s45_s24 = smul.u32 3, %s1406_s21  ;;  %s46_s26 = sadd.s32 1, %s1406_s21 }
   0xa   : > { %s1416_s25 = scalar_select %p19_p0, %s1279_s18, %s21_s23  }
   0xb   : > { %p30_p3 = por %p29_p2, %p28_p1  ;;  %s47_s27 = smul.u32 3, %s46_s26 }
   0xc   : > { %1794 = sst [smem:[#allocation6_spill]] %s1416_s25  ;;  %p58_p4 = scmp.ne.s32.totalorder %s1271_s16, %s1267_s15 }
   0xd   : > { %p130_p5 = scmp.eq.s32.totalorder %s1790_s20, 1  ;;  %s48_s28 = ssub.s32 %s45_s24, %s47_s27 }
   0xe   : > { %s51_s29 = sadd.s32 1, %s1271_s16  ;;  %p49_p6 = scmp.eq.s32.totalorder %s48_s28, 0 }
   0xf   : > { %p1427_p7 = por %p58_p4, %p29_p2  ;;  %p1434_p8 = por %p130_p5, %p28_p1 }
  0x10   : > { %s1439_s6 = scalar_select %p49_p6, %s1271_s16, %s51_s29  }
  0x11   : > { %p918_p9 = scmp.ge.s32.totalorder %s1283_s19, 2 }
  0x13   : > { %158 = sbr.rel (%p918_p9) target bundleno = 187 (0xbb), region = 24 }
  0x18   : > { %161 = sbr.rel (!%p30_p3) target bundleno = 180 (0xb4), region = 28  ;;  %s163_s7 = sand.u32 (%p30_p3), 1, %s1279_s18  }
  0x19   : > { %s166_s8 = smul.u32 (%p30_p3), 3, %s1283_s19  ;;  %s1797_s0 = sld [smem:[#allocation7_spill]] (%p30_p3) }
  0x1a   : > { %s992_s9 = smul.u32 (%p30_p3), 24, %s163_s7 }
  0x1b   : > { %s167_s10 = ssub.s32 (%p30_p3), 7, %s166_s8  ;;  %s981_s11 = smul.u32 (%p30_p3), 12, %s1283_s19 }
  0x1c   : > { %p168_p10 = scmp.lt.s32.totalorder (%p30_p3), %s167_s10, 3  ;;  %s1452_s24 = scalar_lea.vmem (%p30_p3), [#allocation2], %s992_s9  }
  0x1e   : > { %s1815_s10 = smov (!%p168_p10, %s167_s10), 3 }
  0x1f   : > { %s1448_s14 = scalar_lea.vmem %s1797_s0, %s981_s11   ;;  %s919_s22 = sshll.u32 %s1815_s10, 3 }
  0x20   : > { %s1450_s23 = sshll.u32 %s1815_s10, 2  ;;  %p923_p11 = scmp.eq.s32.totalorder %s919_s22, 0 }
  0x21   : > { %p178_p12 = scmp.lt.u32.totalorder (!%p923_p11), %s1450_s23, 8 }
  0x22   : > { %177 = sbr.rel (%p923_p11) target bundleno = 180 (0xb4), region = 32 }
  0x27   : > { %181 = sbr.rel (%p178_p12) target bundleno = 170 (0xaa), region = 36  ;;  %s1456_s26 = sand.u32 (!%p178_p12), 7, %s1450_s23  }
  0x28   : > { %p200_p13 = scmp.eq.s32.totalorder (!%p178_p12), %s1456_s26, 0  ;;  %p924_p0 = scmp.ne.s32.totalorder (!%p178_p12), %s1456_s26, 0 }
  0x2c   : > { %203 = sbr.rel (%p924_p0) target bundleno = 104 (0x68), region = 51  ;;  %s204_s27 = sshrl.u32 (!%p924_p0), %s1450_s23, 3 }
  0x2d   : > { %s1463_s28 = sshrl.u32 (!%p924_p0), %s204_s27, 4 }
  0x2e   : > { %p925_p1 = scmp.le.s32.totalorder (!%p924_p0), %s1463_s28, 0 }
  0x31   : > { %838 = sbr.rel (%p925_p1) target bundleno = 87 (0x57), region = 230  ;;  %s1798_s29 = smov (!%p925_p1), %s1452_s24 }
  0x32   : > { %s1799_s7 = smov (!%p925_p1), %s1448_s14  ;;  %s1472_s8 = smov (!%p925_p1), 0  }
  0x33   : > { %s1474_s9 = smov (!%p925_p1), 0  }
  0x36 LB: >> { %v217_v0 = vld [vmem:[%s1291_s7 + $0x8] sm:$0xff]  ;;  %v219_v1 = vld [vmem:[%s1291_s7 + $0x10] sm:$0xff]  ;;  %v221_v2 = vld [vmem:[%s1291_s7 + $0x18] sm:$0xff]  ;;  %s279_s10 = sadd.s32 1, %s1295_s8  ;;  %s209_s9 = sadd.s32 1, %s1299_s9   ;;  %s1299_s9 = sphi %s1474_s9, %s209_s9   ;;  %s1295_s8 = sphi %s1472_s8, %s1802_s8   ;;  %s1291_s7 = sphi %s1799_s7, %s1801_s7   ;;  %s1287_s29 = sphi %s1798_s29, %s1800_s29  }
  0x37   : >> { %218 = vst [vmem:[%s1287_s29 + $0x8] sm:$0xff] %v217_v0  ;;  %v223_v3 = vld [vmem:[%s1291_s7 + $0x20] sm:$0xff]  ;;  %v225_v4 = vld [vmem:[%s1291_s7 + $0x28] sm:$0xff]  ;;  %v227_v5 = vld [vmem:[%s1291_s7 + $0x30] sm:$0xff]  ;;  %p280_p2 = scmp.ge.s32.totalorder %s279_s10, %s1463_s28  ;;  %p208_p3 = scmp.ge.s32.totalorder %s209_s9, %s1463_s28 }
  0x38   : >> { %220 = vst [vmem:[%s1287_s29 + $0x10] sm:$0xff] %v219_v1  ;;  %v229_v6 = vld [vmem:[%s1291_s7 + $0x38] sm:$0xff]  ;;  %v231_v7 = vld [vmem:[%s1291_s7 + $0x40] sm:$0xff]  ;;  %v233_v8 = vld [vmem:[%s1291_s7 + $0x48] sm:$0xff] }
  0x39   : >> { %222 = vst [vmem:[%s1287_s29 + $0x18] sm:$0xff] %v221_v2  ;;  %s1817_s10 = smov (%p280_p2, %s279_s10), 0  ;;  %v235_v9 = vld [vmem:[%s1291_s7 + $0x50] sm:$0xff]  ;;  %v237_v10 = vld [vmem:[%s1291_s7 + $0x58] sm:$0xff]  ;;  %v239_v11 = vld [vmem:[%s1291_s7 + $0x60] sm:$0xff] }
  0x3a   : >> { %224 = vst [vmem:[%s1287_s29 + $0x20] sm:$0xff] %v223_v3  ;;  %s926_s11 = sshll.u32 %s1817_s10, 7  ;;  %v241_v12 = vld [vmem:[%s1291_s7 + $0x68] sm:$0xff]  ;;  %v243_v13 = vld [vmem:[%s1291_s7 + $0x70] sm:$0xff]  ;;  %v245_v14 = vld [vmem:[%s1291_s7 + $0x78] sm:$0xff]  ;;  %s1802_s8 = smov %s1817_s10 }
  0x3b   : >> { %226 = vst [vmem:[%s1287_s29 + $0x28] sm:$0xff] %v225_v4  ;;  %s1510_s12 = scalar_lea.vmem %s1448_s14, %s926_s11   ;;  %s1513_s13 = scalar_lea.vmem %s1452_s24, %s926_s11 [#allocation2]   ;;  %v215_v15 = vld [vmem:[%s1291_s7] sm:$0xff]  ;;  %v251_v18 = vld [vmem:[%s1291_s7 + $0x2c] sm:$0xff]  ;;  %v253_v19 = vld [vmem:[%s1291_s7 + $0x34] sm:$0xff] }
  0x3c   : >> { %228 = vst [vmem:[%s1287_s29 + $0x30] sm:$0xff] %v227_v5  ;;  %v247_v16 = vld [vmem:[%s1291_s7 + $0x1c] sm:$0xff]  ;;  %v249_v17 = vld [vmem:[%s1291_s7 + $0x24] sm:$0xff]  ;;  %v259_v22 = vld [vmem:[%s1291_s7 + $0x4c] sm:$0xff] }
  0x3d   : >> { %230 = vst [vmem:[%s1287_s29 + $0x38] sm:$0xff] %v229_v6  ;;  %v255_v20 = vld [vmem:[%s1291_s7 + $0x3c] sm:$0xff]  ;;  %v257_v21 = vld [vmem:[%s1291_s7 + $0x44] sm:$0xff]  ;;  %v261_v23 = vld [vmem:[%s1291_s7 + $0x54] sm:$0xff] }
  0x3e   : >> { %232 = vst [vmem:[%s1287_s29 + $0x40] sm:$0xff] %v231_v7  ;;  %v263_v24 = vld [vmem:[%s1291_s7 + $0x5c] sm:$0xff]  ;;  %v265_v25 = vld [vmem:[%s1291_s7 + $0x64] sm:$0xff]  ;;  %v267_v26 = vld [vmem:[%s1291_s7 + $0x6c] sm:$0xff] }
  0x3f   : >> { %234 = vst [vmem:[%s1287_s29 + $0x48] sm:$0xff] %v233_v8  ;;  %v269_v27 = vld [vmem:[%s1291_s7 + $0x74] sm:$0xff]  ;;  %v271_v28 = vld [vmem:[%s1291_s7 + $0x7c] sm:$0xff]  ;;  %v273_v29 = vld [vmem:[%s1291_s7 + $0x84] sm:$0xff] }
  0x40   : >> { %236 = vst [vmem:[%s1287_s29 + $0x50] sm:$0xff] %v235_v9  ;;  %v275_v30 = vld [vmem:[%s1291_s7 + $0x8c] sm:$0xff]  ;;  %v277_v31 = vld [vmem:[%s1291_s7 + $0x94] sm:$0xff]  ;;  %s1801_s7 = smov %s1510_s12 }
  0x41   : >> { %238 = vst [vmem:[%s1287_s29 + $0x58] sm:$0xff] %v237_v10 }
  0x42   : >> { %240 = vst [vmem:[%s1287_s29 + $0x60] sm:$0xff] %v239_v11 }
  0x43   : >> { %242 = vst [vmem:[%s1287_s29 + $0x68] sm:$0xff] %v241_v12 }
  0x44   : >> { %244 = vst [vmem:[%s1287_s29 + $0x70] sm:$0xff] %v243_v13 }
  0x45   : >> { %246 = vst [vmem:[%s1287_s29 + $0x78] sm:$0xff] %v245_v14 }
  0x46   : >> { %216 = vst [vmem:[%s1287_s29] sm:$0xff] %v215_v15 }
  0x47   : >> { %248 = vst [vmem:[%s1287_s29 + $0xc] sm:$0xff] %v247_v16 }
  0x48   : >> { %250 = vst [vmem:[%s1287_s29 + $0x14] sm:$0xff] %v249_v17 }
  0x49   : >> { %252 = vst [vmem:[%s1287_s29 + $0x1c] sm:$0xff] %v251_v18 }
  0x4a   : >> { %254 = vst [vmem:[%s1287_s29 + $0x24] sm:$0xff] %v253_v19 }
  0x4b   : >> { %256 = vst [vmem:[%s1287_s29 + $0x2c] sm:$0xff] %v255_v20 }
  0x4c   : >> { %258 = vst [vmem:[%s1287_s29 + $0x34] sm:$0xff] %v257_v21 }
  0x4d   : >> { %260 = vst [vmem:[%s1287_s29 + $0x3c] sm:$0xff] %v259_v22 }
  0x4e   : >> { %262 = vst [vmem:[%s1287_s29 + $0x44] sm:$0xff] %v261_v23 }
  0x4f   : >> { %264 = vst [vmem:[%s1287_s29 + $0x4c] sm:$0xff] %v263_v24 }
  0x50   : >> { %266 = vst [vmem:[%s1287_s29 + $0x54] sm:$0xff] %v265_v25 }
  0x51   : >> { %268 = vst [vmem:[%s1287_s29 + $0x5c] sm:$0xff] %v267_v26 }
  0x52   : >> { %270 = vst [vmem:[%s1287_s29 + $0x64] sm:$0xff] %v269_v27  ;;  %211 = sbr.rel (!%p208_p3) target bundleno = 54 (0x36), region = 236 }
  0x53   : >> { %272 = vst [vmem:[%s1287_s29 + $0x6c] sm:$0xff] %v271_v28 }
  0x54   : >> { %274 = vst [vmem:[%s1287_s29 + $0x74] sm:$0xff] %v273_v29 }
  0x55   : >> { %276 = vst [vmem:[%s1287_s29 + $0x7c] sm:$0xff] %v275_v30 }
  0x56   : >> { %278 = vst [vmem:[%s1287_s29 + $0x84] sm:$0xff] %v277_v31  ;;  %s1800_s29 = smov %s1513_s13 }
  0x57 PF: > { %s1575_s22 = sand.u32 15, %s204_s27   ;;  %s982_s11 = sshll.u32 %s1463_s28, 7 }
  0x58   : > { %s1579_s20 = scalar_lea.vmem %s1448_s14, %s982_s11   ;;  %s292_s0 = scalar_lea.vmem %s1452_s24, %s982_s11 [#allocation2]  }
  0x59   : > { %p931_p4 = scmp.le.s32.totalorder %s1575_s22, 0 }
  0x5a   : > { %s1301_s12 = smov (!%p931_p4), %s292_s0   ;;  %s1305_s10 = smov (!%p931_p4), %s1579_s20  }
  0x5b   : > { %852 = sbr.rel (%p931_p4) target bundleno = 104 (0x68), region = 241  ;;  %s1309_s9 = smov (!%p931_p4), 0  }
  0x5c   : > { %s1313_s13 = smov (!%p931_p4), 0  }
  0x60 LB: >> { %v302_v32 = vld [vmem:[%s1307_s10] sm:$0xff]  ;;  %s306_s27 = sadd.s32 1, %s1311_s9  ;;  %s296_s13 = sadd.s32 1, %s1315_s13   ;;  %s1315_s13 = sphi %s1313_s13, %s296_s13   ;;  %s1311_s9 = sphi %s1309_s9, %s1310_s9   ;;  %s1307_s10 = sphi %s1305_s10, %s311_s10   ;;  %s1303_s12 = sphi %s1301_s12, %s312_s12  }
  0x61   : >> { %v304_v33 = vld [vmem:[%s1307_s10 + $0x1c] sm:$0xff]  ;;  %303 = vst [vmem:[%s1303_s12] sm:$0xff] %v302_v32  ;;  %p307_p5 = scmp.ge.s32.totalorder %s306_s27, %s1575_s22  ;;  %p295_p6 = scmp.ge.s32.totalorder %s296_s13, %s1575_s22 }
  0x62   : >> { %305 = vst [vmem:[%s1303_s12 + $0xc] sm:$0xff] %v304_v33 }
  0x63   : >> { %s1819_s27 = smov (%p307_p5, %s306_s27), 0  ;;  %298 = sbr.rel (!%p295_p6) target bundleno = 96 (0x60), region = 247 }
  0x64   : >> { %s932_s28 = sshll.u32 %s1819_s27, 3  ;;  %s1310_s9 = smov %s1819_s27  }
  0x65   : >> { %s311_s10 = scalar_lea.vmem %s1579_s20, %s932_s28   ;;  %s312_s12 = scalar_lea.vmem %s292_s0, %s932_s28 [#allocation2]  }
  0x68 PF: > { %315 = sbr.rel (%p200_p13) target bundleno = 170 (0xaa), region = 69  ;;  %s317_s29 = ssub.s32 (!%p200_p13), %s1450_s23, %s1456_s26 }
  0x69   : > { %s321_s7 = sshrl.u32 (!%p200_p13), %s1450_s23, 3  ;;  %s1593_s8 = scalar_lea.vmem (!%p200_p13), %s1448_s14, %s317_s29 }
  0x6a   : > { %s1596_s11 = scalar_lea.vmem (!%p200_p13), %s1452_s24, %s317_s29 [#allocation2]  ;;  %s1600_s12 = sshrl.u32 (!%p200_p13), %s321_s7, 4 }
  0x6b   : > { %p934_p9 = scmp.le.s32.totalorder (!%p200_p13), %s1600_s12, 0 }
  0x6d   : > { %866 = sbr.rel (%p934_p9) target bundleno = 147 (0x93), region = 252  ;;  %s1803_s0 = smov (!%p934_p9), %s1452_s24 }
  0x6e   : > { %s1804_s20 = smov (!%p934_p9), %s1448_s14  ;;  %s1609_s22 = smov (!%p934_p9), 0  }
  0x6f   : > { %s1611_s10 = smov (!%p934_p9), 0  }
  0x72 LB: >> { %v334_v34 = vld [vmem:[%s1323_s20 + $0x8] sm:$0xff]  ;;  %v336_v35 = vld [vmem:[%s1323_s20 + $0x10] sm:$0xff]  ;;  %v338_v36 = vld [vmem:[%s1323_s20 + $0x18] sm:$0xff]  ;;  %s396_s9 = sadd.s32 1, %s1327_s22  ;;  %s326_s10 = sadd.s32 1, %s1331_s10   ;;  %s1331_s10 = sphi %s1611_s10, %s326_s10   ;;  %s1327_s22 = sphi %s1609_s22, %s1807_s22   ;;  %s1323_s20 = sphi %s1804_s20, %s1806_s20   ;;  %s1319_s0 = sphi %s1803_s0, %s1805_s0  }
  0x73   : >> { %335 = vst [vmem:[%s1319_s0 + $0x8] sm:$0xff] %v334_v34  ;;  %v340_v37 = vld [vmem:[%s1323_s20 + $0x20] sm:$0xff]  ;;  %v342_v38 = vld [vmem:[%s1323_s20 + $0x28] sm:$0xff]  ;;  %v344_v39 = vld [vmem:[%s1323_s20 + $0x30] sm:$0xff]  ;;  %p397_p10 = scmp.ge.s32.totalorder %s396_s9, %s1600_s12  ;;  %p325_p11 = scmp.ge.s32.totalorder %s326_s10, %s1600_s12 }
  0x74   : >> { %337 = vst [vmem:[%s1319_s0 + $0x10] sm:$0xff] %v336_v35  ;;  %v346_v40 = vld [vmem:[%s1323_s20 + $0x38] sm:$0xff]  ;;  %v348_v41 = vld [vmem:[%s1323_s20 + $0x40] sm:$0xff]  ;;  %v350_v42 = vld [vmem:[%s1323_s20 + $0x48] sm:$0xff] }
  0x75   : >> { %339 = vst [vmem:[%s1319_s0 + $0x18] sm:$0xff] %v338_v36  ;;  %s1821_s9 = smov (%p397_p10, %s396_s9), 0  ;;  %v352_v43 = vld [vmem:[%s1323_s20 + $0x50] sm:$0xff]  ;;  %v354_v44 = vld [vmem:[%s1323_s20 + $0x58] sm:$0xff]  ;;  %v356_v45 = vld [vmem:[%s1323_s20 + $0x60] sm:$0xff] }
  0x76   : >> { %341 = vst [vmem:[%s1319_s0 + $0x20] sm:$0xff] %v340_v37  ;;  %s935_s13 = sshll.u32 %s1821_s9, 7  ;;  %v358_v46 = vld [vmem:[%s1323_s20 + $0x68] sm:$0xff]  ;;  %v360_v47 = vld [vmem:[%s1323_s20 + $0x70] sm:$0xff]  ;;  %v362_v48 = vld [vmem:[%s1323_s20 + $0x78] sm:$0xff]  ;;  %s1807_s22 = smov %s1821_s9 }
  0x77   : >> { %343 = vst [vmem:[%s1319_s0 + $0x28] sm:$0xff] %v342_v38  ;;  %s1647_s27 = scalar_lea.vmem %s1448_s14, %s935_s13   ;;  %s1650_s28 = scalar_lea.vmem %s1452_s24, %s935_s13 [#allocation2]   ;;  %v332_v49 = vld [vmem:[%s1323_s20] sm:$0xff]  ;;  %v368_v52 = vld [vmem:[%s1323_s20 + $0x2c] sm:$0xff]  ;;  %v370_v53 = vld [vmem:[%s1323_s20 + $0x34] sm:$0xff] }
  0x78   : >> { %345 = vst [vmem:[%s1319_s0 + $0x30] sm:$0xff] %v344_v39  ;;  %v364_v50 = vld [vmem:[%s1323_s20 + $0x1c] sm:$0xff]  ;;  %v366_v51 = vld [vmem:[%s1323_s20 + $0x24] sm:$0xff]  ;;  %v376_v56 = vld [vmem:[%s1323_s20 + $0x4c] sm:$0xff] }
  0x79   : >> { %347 = vst [vmem:[%s1319_s0 + $0x38] sm:$0xff] %v346_v40  ;;  %v372_v54 = vld [vmem:[%s1323_s20 + $0x3c] sm:$0xff]  ;;  %v374_v55 = vld [vmem:[%s1323_s20 + $0x44] sm:$0xff]  ;;  %v378_v57 = vld [vmem:[%s1323_s20 + $0x54] sm:$0xff] }
  0x7a   : >> { %349 = vst [vmem:[%s1319_s0 + $0x40] sm:$0xff] %v348_v41  ;;  %v380_v58 = vld [vmem:[%s1323_s20 + $0x5c] sm:$0xff]  ;;  %v382_v59 = vld [vmem:[%s1323_s20 + $0x64] sm:$0xff]  ;;  %v384_v60 = vld [vmem:[%s1323_s20 + $0x6c] sm:$0xff] }
  0x7b   : >> { %351 = vst [vmem:[%s1319_s0 + $0x48] sm:$0xff] %v350_v42  ;;  %v386_v61 = vld [vmem:[%s1323_s20 + $0x74] sm:$0xff]  ;;  %v388_v62 = vld [vmem:[%s1323_s20 + $0x7c] sm:$0xff]  ;;  %v390_v63 = vld [vmem:[%s1323_s20 + $0x84] sm:$0xff] }
  0x7c   : >> { %353 = vst [vmem:[%s1319_s0 + $0x50] sm:$0xff] %v352_v43  ;;  %v392_v0 = vld [vmem:[%s1323_s20 + $0x8c] sm:$0xff]  ;;  %v394_v1 = vld [vmem:[%s1323_s20 + $0x94] sm:$0xff]  ;;  %s1806_s20 = smov %s1647_s27 }
  0x7d   : >> { %355 = vst [vmem:[%s1319_s0 + $0x58] sm:$0xff] %v354_v44 }
  0x7e   : >> { %357 = vst [vmem:[%s1319_s0 + $0x60] sm:$0xff] %v356_v45 }
  0x7f   : >> { %359 = vst [vmem:[%s1319_s0 + $0x68] sm:$0xff] %v358_v46 }
  0x80   : >> { %361 = vst [vmem:[%s1319_s0 + $0x70] sm:$0xff] %v360_v47 }
  0x81   : >> { %363 = vst [vmem:[%s1319_s0 + $0x78] sm:$0xff] %v362_v48 }
  0x82   : >> { %333 = vst [vmem:[%s1319_s0] sm:$0xff] %v332_v49 }
  0x83   : >> { %365 = vst [vmem:[%s1319_s0 + $0xc] sm:$0xff] %v364_v50 }
  0x84   : >> { %367 = vst [vmem:[%s1319_s0 + $0x14] sm:$0xff] %v366_v51 }
  0x85   : >> { %369 = vst [vmem:[%s1319_s0 + $0x1c] sm:$0xff] %v368_v52 }
  0x86   : >> { %371 = vst [vmem:[%s1319_s0 + $0x24] sm:$0xff] %v370_v53 }
  0x87   : >> { %373 = vst [vmem:[%s1319_s0 + $0x2c] sm:$0xff] %v372_v54 }
  0x88   : >> { %375 = vst [vmem:[%s1319_s0 + $0x34] sm:$0xff] %v374_v55 }
  0x89   : >> { %377 = vst [vmem:[%s1319_s0 + $0x3c] sm:$0xff] %v376_v56 }
  0x8a   : >> { %379 = vst [vmem:[%s1319_s0 + $0x44] sm:$0xff] %v378_v57 }
  0x8b   : >> { %381 = vst [vmem:[%s1319_s0 + $0x4c] sm:$0xff] %v380_v58 }
  0x8c   : >> { %383 = vst [vmem:[%s1319_s0 + $0x54] sm:$0xff] %v382_v59 }
  0x8d   : >> { %385 = vst [vmem:[%s1319_s0 + $0x5c] sm:$0xff] %v384_v60 }
  0x8e   : >> { %387 = vst [vmem:[%s1319_s0 + $0x64] sm:$0xff] %v386_v61  ;;  %328 = sbr.rel (!%p325_p11) target bundleno = 114 (0x72), region = 258 }
  0x8f   : >> { %389 = vst [vmem:[%s1319_s0 + $0x6c] sm:$0xff] %v388_v62 }
  0x90   : >> { %391 = vst [vmem:[%s1319_s0 + $0x74] sm:$0xff] %v390_v63 }
  0x91   : >> { %393 = vst [vmem:[%s1319_s0 + $0x7c] sm:$0xff] %v392_v0 }
  0x92   : >> { %395 = vst [vmem:[%s1319_s0 + $0x84] sm:$0xff] %v394_v1  ;;  %s1805_s0 = smov %s1650_s28 }
  0x93 PF: > { %s1712_s29 = sand.u32 15, %s321_s7   ;;  %s984_s13 = sshll.u32 %s1600_s12, 7 }
  0x94   : > { %s1716_s25 = scalar_lea.vmem %s1448_s14, %s984_s13   ;;  %s409_s18 = scalar_lea.vmem %s1452_s24, %s984_s13 [#allocation2]  }
  0x95   : > { %p940_p12 = scmp.le.s32.totalorder %s1712_s29, 0 }
  0x96   : > { %s1333_s27 = smov (!%p940_p12), %s409_s18   ;;  %s1337_s9 = smov (!%p940_p12), %s1716_s25  }
  0x97   : > { %880 = sbr.rel (%p940_p12) target bundleno = 164 (0xa4), region = 263  ;;  %s1341_s10 = smov (!%p940_p12), 0  }
  0x98   : > { %s1345_s28 = smov (!%p940_p12), 0  }
  0x9c LB: >> { %v419_v2 = vld [vmem:[%s1339_s9] sm:$0xff]  ;;  %s423_s7 = sadd.s32 1, %s1343_s10  ;;  %s413_s28 = sadd.s32 1, %s1347_s28   ;;  %s1347_s28 = sphi %s1345_s28, %s413_s28   ;;  %s1343_s10 = sphi %s1341_s10, %s1342_s10   ;;  %s1339_s9 = sphi %s1337_s9, %s428_s9   ;;  %s1335_s27 = sphi %s1333_s27, %s429_s27  }
  0x9d   : >> { %v421_v3 = vld [vmem:[%s1339_s9 + $0x1c] sm:$0xff]  ;;  %420 = vst [vmem:[%s1335_s27] sm:$0xff] %v419_v2  ;;  %p424_p13 = scmp.ge.s32.totalorder %s423_s7, %s1712_s29  ;;  %p412_p0 = scmp.ge.s32.totalorder %s413_s28, %s1712_s29 }
  0x9e   : >> { %422 = vst [vmem:[%s1335_s27 + $0xc] sm:$0xff] %v421_v3 }
  0x9f   : >> { %s1823_s7 = smov (%p424_p13, %s423_s7), 0  ;;  %415 = sbr.rel (!%p412_p0) target bundleno = 156 (0x9c), region = 269 }
  0xa0   : >> { %s941_s12 = sshll.u32 %s1823_s7, 3  ;;  %s1342_s10 = smov %s1823_s7  }
  0xa1   : >> { %s428_s9 = scalar_lea.vmem %s1716_s25, %s941_s12   ;;  %s429_s27 = scalar_lea.vmem %s409_s18, %s941_s12 [#allocation2]  }
  0xa4 PF: > { %s1349_s0 = smov 1  }
  0xa5   : > { %s430_s20 = sshll.u32 %s1349_s0, %s1456_s26 }
  0xa6   : > { %s943_s22 = sadd.s32 4294967295, %s430_s20 }
  0xa7   : > { %v440_v4 = vld [vmem:[%s1593_s8] sm:%s943_s22] }
  0xa8   : > { %v442_v5 = vld [vmem:[%s1593_s8 + $0x1c] sm:%s943_s22]  ;;  %441 = vst [vmem:[%s1596_s11] sm:%s943_s22] %v440_v4 }
  0xa9   : > { %443 = vst [vmem:[%s1596_s11 + $0xc] sm:%s943_s22] %v442_v5 }
  0xaa PF: > { %p944_p1 = scmp.ge.u32.totalorder %s1450_s23, 8 }
  0xab   : > { %s1350_s13 = smov (!%p944_p1), 1  }
  0xac   : > { %184 = sbr.rel (%p944_p1) target bundleno = 180 (0xb4), region = 40  ;;  %s185_s18 = sshll.u32 (!%p944_p1), %s1350_s13, %s1450_s23 }
  0xad   : > { %s945_s25 = sadd.s32 (!%p944_p1), 4294967295, %s185_s18 }
  0xb1   : > { %v195_v6 = vld [vmem:[%s1448_s14] sm:%s945_s25] }
  0xb2   : > { %v197_v7 = vld [vmem:[%s1448_s14 + $0x1c] sm:%s945_s25]  ;;  %196 = vst [vmem:[%s1452_s24] sm:%s945_s25] %v195_v6 }
  0xb3   : > { %198 = vst [vmem:[%s1452_s24 + $0xc] sm:%s945_s25] %v197_v7 }
  0xb4 PF: > { %447 = sbr.rel (!%p1427_p7) target bundleno = 187 (0xbb), region = 94  ;;  %s449_s26 = sand.u32 (%p1427_p7), 1, %s1271_s16  }
  0xb5   : > { %s794_s8 = smul.u32 (%p1427_p7), 12, %s1283_s19  ;;  %s946_s11 = sshll.u32 (%p1427_p7), %s449_s26, 3 }
  0xb6   : > { %s451_s14 = scalar_lea.vmem (%p1427_p7), [#allocation3], %s946_s11 }
  0xb7   : > { %s795_s23 = scalar_lea.vmem (%p1427_p7), %s1786_s1, %s794_s8 }
  0xb8   : > { %v947_v8 = vld [vmem:[%s795_s23 + $0xc] sm:$0xf] (%p1427_p7)  ;;  %v948_v9 = vld [vmem:[%s795_s23 + $0x28] sm:$0xf] (%p1427_p7) }
  0xb9   : > { %473 = vst [vmem:[%s451_s14] sm:$0xf] %v947_v8 }
  0xba   : > { %475 = vst [vmem:[%s451_s14 + $0x4] sm:$0xf] %v948_v9 }
  0xbb PF: > { %p949_p2 = scmp.ge.s32.totalorder %s1283_s19, 1  ;;  %p502_p7 = scmp.lt.s32.totalorder %s1283_s19, 3 }
  0xbd   : > { %p503_p3 = pnand %p949_p2, %p502_p7 }
  0xbe   : > { %s509_s30 = sand.u32 (!%p503_p3), 1, %s1275_s17   ;;  %s516_s9 = sand.u32 (!%p503_p3), 1, %s1267_s15  }
  0xbf   : > { %506 = sbr.rel (%p503_p3) target bundleno = 501 (0x1f5), region = 135  ;;  %s950_s28 = sshll.u32 (!%p503_p3), %s516_s9, 3 }
  0xc0   : > { %s1745_s24 = smul.u32 (!%p503_p3), 24, %s509_s30  ;;  %s1351_s7 = smov (!%p503_p3), 127  }
  0xc1   : > { %s1352_s12 = smov (!%p503_p3), 126   ;;  %s518_s0 = scalar_lea.vmem (!%p503_p3), [#allocation3], %s950_s28 }
  0xc2   : > { %s511_s10 = scalar_lea.vmem (!%p503_p3), [#allocation2], %s1745_s24  ;;  %s543_s25 = scalar_lea.vmem (!%p503_p3), [#allocation4], %s1745_s24 }
  0xc4   : > { %v961_v10 = vld [vmem:[%s511_s10 + $0x8] sm:$0xf]  ;;  %v988_v11 = vld [vmem:[%s511_s10 + $0x10] sm:$0xf0]  ;;  %v953_v13 = vld [vmem:[%s511_s10] sm:$0xf] }
  0xc5   : > { %v962_v12 = vor.u32 %v988_v11, %v961_v10  ;;  %v987_v14 = vld [vmem:[%s511_s10 + $0x8] sm:$0xf0]  ;;  %v989_v16 = vld [vmem:[%s518_s0] sm:$0xff]  ;;  %vm603_vm0 = vcmask 1031168   ;;  %v1353_v25 = vmov 0   ;;  %vm588_vm1 = vcmask 1039360  }
  0xc6   : > { %v954_v15 = vor.u32 %v987_v14, %v953_v13  ;;  %v986_v17 = vld [vmem:[%s511_s10 + $0x4] sm:$0xf]  ;;  %v955_v18 = vld [vmem:[%s511_s10 + $0xc] sm:$0xf0]  ;;  %1168 = vset.pattern.permute.xlu0 %v1353_v25  ;;  %1167 = vset.pattern.permute.xlu2 %v1353_v25  ;;  %vm629_vm2 = vcmask 392192   ;;  %s1808_s26 = sadd.s32 (%p1434_p8), 4294967295, %s1283_s19  }
  0xc7   : > { %584 = vrot.lane.b32.xlu1 %v962_v12, %s1351_s7  ;;  %599 = vrot.lane.b32.xlu0 %v962_v12, %s1352_s12  ;;  %v958_v19 = vor.u32 %v986_v17, %v955_v18  ;;  %v613_v23 = vld [vmem:[%s1788_s3 + $0x8] sm:$0xff]  ;;  %v612_v24 = vld [vmem:[%s1788_s3] sm:$0xff]  ;;  %s991_s8 = smul.u32 (%p1434_p8), 12, %s1808_s26 }
  0xc8   : > { %595 = vrot.lane.b32.xlu2 %v954_v15, %s1352_s12  ;;  %v990_v37 = vld [vmem:[%s1787_s2] sm:$0xff] }
  0xc9   : > { %s716_s27 = scalar_lea.vmem (%p1434_p8), %s1789_s4, %s991_s8 }
  0xcf   : > { %586 = vrot.lane.b32.xlu1 %v989_v16, %s1351_s7  ;;  %601 = vrot.lane.b32.xlu0 %v989_v16, %s1352_s12 }
  0xd0   : > { %597 = vrot.lane.b32.xlu2 %v958_v19, %s1352_s12 }
  0xd7   : > { %580 = vrot.lane.b32.xlu0 %v954_v15, %s1351_s7  ;;  %582 = vrot.lane.b32.xlu1 %v958_v19, %s1351_s7 }
  0xd8   : > { %616 = vperm.xlu2 %1167, %v612_v24  }
  0xdf   : > { %621 = vperm.xlu0 %1168, %v613_v23  }
 0x122   : > { %v596_v20 = vpop.permute.xlu2 %595 }
 0x12a   : > { %v598_v21 = vpop.permute.xlu2 %597 }
 0x12b   : > { %v604_v22 = vsel %vm603_vm0, %v596_v20, %v598_v21 }
 0x12c   : > { %638 = vmatpush.bf16.msra.mxu0 %v604_v22 }
 0x132   : > { %v617_v38 = vpop.permute.xlu2 %616 }
 0x139   : > { %v585_v26 = vpop.permute.xlu1 %584  ;;  %v600_v27 = vpop.permute.xlu0 %599 }
 0x13a   : > { %v605_v28 = vsel %vm603_vm0, %v598_v21, %v600_v27 }
 0x13b   : > { %652 = vmatpush.bf16.msra.mxu1 %v605_v28 }
 0x141   : > { %v587_v29 = vpop.permute.xlu1 %586  ;;  %v602_v30 = vpop.permute.xlu0 %601 }
 0x142   : > { %v606_v31 = vsel %vm603_vm0, %v600_v27, %v602_v30  ;;  %v591_v32 = vsel %vm588_vm1, %v585_v26, %v587_v29 }
 0x143   : > { %666 = vmatpush.bf16.msra.mxu2 %v606_v31 }
 0x147   : > { %667 = vmatpush.bf16.msra.mxu2 %v591_v32 }
 0x149   : > { %v581_v33 = vpop.permute.xlu0 %580  ;;  %v583_v34 = vpop.permute.xlu1 %582 }
 0x14a   : > { %v589_v35 = vsel %vm588_vm1, %v581_v33, %v583_v34  ;;  %v590_v36 = vsel %vm588_vm1, %v583_v34, %v585_v26 }
 0x14b   : > { %639 = vmatpush.bf16.msra.mxu0 %v589_v35  ;;  %653 = vmatpush.bf16.msra.mxu1 %v590_v36 }
 0x14c   : > { %668 = vmatpush.bf16.msra.mxu2 %v962_v12 }
 0x14f   : > { %973 = vmatmul.msk.bf16.vlgmr.msra.gmra.mxu2 %vm629_vm2, %v990_v37  ;;  %640 = vmatpush.bf16.msra.mxu0 %v954_v15 }
 0x150   : > { %654 = vmatpush.bf16.msra.mxu1 %v958_v19 }
 0x151   : > { %v622_v50 = vpop.permute.xlu0 %621 }
 0x152   : > { %971 = vmatmul.msk.bf16.vlgmr.msra.gmra.mxu0 %vm629_vm2, %v990_v37 }
 0x153   : > { %972 = vmatmul.msk.bf16.vlgmr.msra.gmra.mxu1 %vm629_vm2, %v990_v37 }
 0x1cf   : > { %v642_v39 = vpop.f32.mrf.mxu0 }
 0x1d0   : > { %v656_v40 = vpop.f32.mrf.mxu1  ;;  %v643_v41 = vadd.f32 %v642_v39, %v617_v38 }
 0x1d1   : > { %v657_v42 = vadd.f32 %v656_v40, %v617_v38 }
 0x1d2   : > { %v675_v43 = vand.u32 2147483647, %v643_v41  ;;  %v670_v44 = vpop.f32.mrf.mxu2 }
 0x1d3   : > { %v676_v45 = vand.u32 2147483647, %v657_v42  ;;  %v671_v46 = vadd.f32 %v670_v44, %v617_v38 }
 0x1d4   : > { %v681_v47 = vadd.f32 1.0, %v675_v43 }
 0x1d5   : > { %v682_v48 = vadd.f32 1.0, %v676_v45  ;;  %v677_v49 = vand.u32 2147483647, %v671_v46 }
 0x1d6   : > { %1169 = vrcp.f32 %v681_v47 }
 0x1d7   : > { %1171 = vrcp.f32 %v682_v48  ;;  %v683_v51 = vadd.f32 1.0, %v677_v49  ;;  %v644_v52 = vpop.f32.mrf.mxu0 }
 0x1d8   : > { %v645_v53 = vadd.f32 %v644_v52, %v622_v50  ;;  %v658_v54 = vpop.f32.mrf.mxu1 }
 0x1d9   : > { %1173 = vrcp.f32 %v683_v51  ;;  %v659_v55 = vadd.f32 %v658_v54, %v622_v50 }
 0x1da   : > { %v678_v56 = vand.u32 2147483647, %v645_v53  ;;  %v672_v57 = vpop.f32.mrf.mxu2 }
 0x1db   : > { %v679_v58 = vand.u32 2147483647, %v659_v55  ;;  %v673_v59 = vadd.f32 %v672_v57, %v622_v50 }
 0x1dc   : > { %v1170_v60 = vpop.eup %1169  ;;  %v684_v61 = vadd.f32 1.0, %v678_v56 }
 0x1dd   : > { %v1172_v62 = vpop.eup %1171  ;;  %v693_v63 = vmul.f32 %v1170_v60, %v643_v41  ;;  %v685_v0 = vadd.f32 1.0, %v679_v58  ;;  %v680_v1 = vand.u32 2147483647, %v673_v59 }
 0x1de   : > { %v694_v2 = vmul.f32 %v1172_v62, %v657_v42  ;;  %1175 = vrcp.f32 %v684_v61 }
 0x1df   : > { %v1174_v3 = vpop.eup %1173  ;;  %1177 = vrcp.f32 %v685_v0  ;;  %v686_v4 = vadd.f32 1.0, %v680_v1 }
 0x1e0   : > { %v699_v5 = vpack.c.bf16 %v694_v2, %v693_v63  ;;  %v695_v6 = vmul.f32 %v1174_v3, %v671_v46 }
 0x1e1   : > { %1179 = vrcp.f32 %v686_v4 }
 0x1e2   : > { %703 = vst [vmem:[%s543_s25] sm:$0xff] %v699_v5  ;;  %v700_v7 = vpack.c.bf16 %v695_v6, %v695_v6 }
 0x1e4   : > { %v1176_v8 = vpop.eup %1175  ;;  %704 = vst [vmem:[%s543_s25 + $0x8] sm:$0xf] %v700_v7 }
 0x1e5   : > { %v1178_v9 = vpop.eup %1177  ;;  %v696_v10 = vmul.f32 %v1176_v8, %v645_v53 }
 0x1e6   : > { %v697_v11 = vmul.f32 %v1178_v9, %v659_v55 }
 0x1e7   : > { %v1180_v12 = vpop.eup %1179 }
 0x1e8   : > { %v701_v13 = vpack.c.bf16 %v697_v11, %v696_v10  ;;  %v698_v14 = vmul.f32 %v1180_v12, %v673_v59  ;;  %713 = sbr.rel (!%p1434_p8) target bundleno = 501 (0x1f5), region = 147 }
 0x1e9   : > { %v731_v16 = vld [vmem:[%s543_s25] sm:$0xff] (%p1434_p8) }
 0x1ea   : > { %705 = vst [vmem:[%s543_s25 + $0xc] sm:$0xff] %v701_v13  ;;  %v702_v15 = vpack.c.bf16 %v698_v14, %v698_v14 }
 0x1eb   : > { %v975_v18 = vld [vmem:[%s543_s25 + $0x8] sm:$0xf] (%p1434_p8)  ;;  %732 = vst [vmem:[%s716_s27] sm:$0xff] (%p1434_p8), %v731_v16 }
 0x1ec   : > { %706 = vst [vmem:[%s543_s25 + $0x14] sm:$0xf] %v702_v15 }
 0x1ed   : > { %976 = vst [vmem:[%s716_s27 + $0x8] sm:$0xf] %v975_v18 }
 0x1f1   : > { %v733_v17 = vld [vmem:[%s543_s25 + $0xc] sm:$0xff] }
 0x1f2   : > { %734 = vst [vmem:[%s716_s27 + $0x18] sm:$0xff] %v733_v17 }
 0x1f3   : > { %v977_v19 = vld [vmem:[%s543_s25 + $0x14] sm:$0xf] }
 0x1f4   : > { %978 = vst [vmem:[%s716_s27 + $0x20] sm:$0xf] %v977_v19 }
 0x1f5 PF: > { %s1809_s17 = sld [smem:[#allocation5_spill]]  ;;  %p11_p8 = scmp.ge.s32.totalorder %s1406_s21, 4  }
 0x1f6   : > { %s1810_s18 = sld [smem:[#allocation6_spill]]  ;;  %s1811_s15 = smov %s1271_s16 }
 0x1f7   : > { %s1812_s16 = smov %s1439_s6  ;;  %s1813_s19 = smov %s1406_s21 }
 0x1f8   :  { %13 = sbr.rel (!%p11_p8) target bundleno = 5 (0x5), region = 280 }

</bundles_post_ra>
